<compile_context>
chip_gen: v7x
topology: tpu7x:2x2x1
jax: 0.10.0
libtpu: 0.0.40
codegen_flags: <defaults>
</compile_context>

<pallas_src>
import jax
import jax.numpy as jnp
from jax.experimental import pallas as pl
from jax.experimental.pallas import tpu as pltpu


def _regression_head_kernel(x_ref, w_ref, b_ref, o_ref):
    # Hot path: one (tb, H) x (H, L) MXU matmul + bias add, f32 accumulate.
    x = x_ref[...]                                           # [tb, H] (f32 or bf16)
    w = w_ref[...]                                           # [H,  L] resident
    acc = jnp.dot(x, w, preferred_element_type=jnp.float32)  # f32 accumulate
    acc = acc + b_ref[...].astype(jnp.float32)               # [1, L] broadcast
    o_ref[...] = acc.astype(o_ref.dtype)


def prepare_regressor_params(weight, bias, dtype=None):
    """One-time prep: PyTorch nn.Linear weight [L, H] -> [H, L] (+ optional cast).

    Do this at init / checkpoint-load time so the per-call path never pays an
    extra XLA transpose + HBM copy.  `dtype=jnp.bfloat16` stores the weight in
    the streaming dtype up front (bias stays f32 for the f32 accumulate).
    """
    L, H = weight.shape
    assert bias.shape == (L,), f"bias shape {bias.shape} != ({L},)"
    w_t = weight.T
    if dtype is not None:
        w_t = w_t.astype(dtype)
    return w_t, bias.reshape(1, L).astype(jnp.float32)


def fuse_head_params(heads, dtype=None):
    """Fuse several (weight [L_i, H], bias [L_i]) heads into one [H, sum(L_i)] matmul.

    pooled_output is the dominant HBM stream; fusing reads it once for all heads
    and widens the output lane dimension toward 128 (lane-dense stores).
    """
    w_t = jnp.concatenate([w.T for w, _ in heads], axis=1)
    b = jnp.concatenate([b for _, b in heads], axis=0)
    if dtype is not None:
        w_t = w_t.astype(dtype)
    return w_t, b.reshape(1, -1).astype(jnp.float32)


def _vmem_budget_bytes():
    # Physical VMEM minus fixed headroom for compiler internal scratch.
    try:
        cap = pltpu.get_tpu_info().vmem_capacity_bytes
    except Exception:
        cap = 64 << 20  # conservative: v7x per-TensorCore VMEM
    return max(cap - (16 << 20), 16 << 20)


def _select_batch_tile(B, H, L, x_bytes, w_bytes, out_bytes, block_b, align):
    """Pick the batch tile: big, 128-aligned, >=2 grid steps for large B, VMEM-safe."""
    budget = _vmem_budget_bytes()
    if B <= 256:
        # Single full-extent block: (B, H) equals full array dims, so the
        # (8/16, 128) tiling rule is satisfied even for tiny / odd B.
        tb = B
    else:
        # >= 2 grid steps so the "parallel" batch axis can shard across v7x's
        # two TensorCores; 128-aligned so x vregs / MXU M-dim stay fully packed.
        half = ((B // 2) // 128) * 128
        tb = min(block_b, max(128, half))
        tb = max(align, (tb // align) * align)

    def vmem_needed(t):
        return (2 * t * H * x_bytes        # double-buffered x stream
                + 2 * t * L * out_bytes    # double-buffered output tiles
                + 2 * H * L * w_bytes      # resident weight (still 2 pipeline bufs)
                + 2 * 8 * 128 * 4)         # bias tile (padded), 2 bufs

    while tb > align and vmem_needed(tb) > budget:
        tb = max(align, ((tb // 2) // align) * align)
    return tb, vmem_needed(tb), budget


def sequence_regression_head(sequence_output, pooled_output, weight_t, bias2,
                             labels=None, *, block_b=1024, stream_dtype=None):
    """Pallas implementation of SequenceRegressionHead.forward (eval mode).

    sequence_output: unused by the PyTorch forward (kept for API parity).
    pooled_output:   [B, H]
    weight_t:        [H, L]  pre-transposed nn.Linear weight (prepare_regressor_params)
    bias2:           [1, L]  f32
    stream_dtype:    e.g. jnp.bfloat16 to halve HBM traffic on the [B, H] stream
                     (f32 accumulate is kept; output stays f32).
    Returns (regr_output [B, L], loss) with loss=None when labels is None.
    """
    del sequence_output  # unused, as in the reference forward
    B, H = pooled_output.shape
    H2, L = weight_t.shape
    assert H2 == H, f"weight_t must be [H, L]; got {weight_t.shape}, H={H}"
    assert bias2.shape == (1, L), f"bias2 must be [1, L]; got {bias2.shape}"

    x = pooled_output
    w = weight_t
    if stream_dtype is not None:
        if x.dtype != stream_dtype:
            x = x.astype(stream_dtype)
        if w.dtype != stream_dtype:
            w = w.astype(stream_dtype)
    out_dtype = bias2.dtype  # f32 output regardless of streaming dtype

    # bf16 sublane packing is (16, 128); f32 is (8, 128).
    align = 16 if jnp.dtype(x.dtype).itemsize == 2 else 8
    tb, vmem_needed, budget = _select_batch_tile(
        B, H, L,
        x_bytes=jnp.dtype(x.dtype).itemsize,
        w_bytes=jnp.dtype(w.dtype).itemsize,
        out_bytes=jnp.dtype(out_dtype).itemsize,
        block_b=block_b, align=align)
    grid_b = pl.cdiv(B, tb)

    compiler_kwargs = dict(dimension_semantics=("parallel",))
    if vmem_needed > (8 << 20):
        # Only override when a big tile would bump into the scoped default
        # (16 MiB on v5e, 32 MiB on v6e/v7x); never exceed the physical budget.
        compiler_kwargs["vmem_limit_bytes"] = int(
            min(max(2 * vmem_needed, 16 << 20), budget))

    regr_output = pl.pallas_call(
        _regression_head_kernel,
        out_shape=jax.ShapeDtypeStruct((B, L), out_dtype),
        grid_spec=pltpu.PrefetchScalarGridSpec(
            num_scalar_prefetch=0,
            grid=(grid_b,),
            in_specs=[
                pl.BlockSpec((tb, H), lambda i: (i, 0)),   # x: streamed over B
                pl.BlockSpec((H, L), lambda i: (0, 0)),    # weight: resident
                pl.BlockSpec((1, L), lambda i: (0, 0)),    # bias: resident
            ],
            out_specs=pl.BlockSpec((tb, L), lambda i: (i, 0)),
        ),
        compiler_params=pltpu.CompilerParams(**compiler_kwargs),
    )(x, w, bias2)

    loss = None
    if labels is not None:
        # TODO(synk): the reference calls MSELoss(regr_output, labels.long()),
        # which truncates fractional targets and is ill-defined in PyTorch
        # (float pred vs long target).  We mirror the .long() truncation and
        # compute a plain MSE; document/guard at the API boundary if fractional
        # regression targets are expected.
        if labels.ndim != 1:
            labels = labels[:, 0]
        lab = labels.astype(jnp.int32).astype(regr_output.dtype)
        loss = jnp.mean((regr_output - lab[:, None]) ** 2)

    return regr_output, loss


if __name__ == "__main__":
    key = jax.random.PRNGKey(0)
    B, S, H, L = 2, 8, 32, 4   # batch, seq, hidden, num_labels

    k1, k2, k3, k4, k5 = jax.random.split(key, 5)
    sequence_output = jax.random.normal(k1, (B, S, H), dtype=jnp.float32)
    pooled_output = jax.random.normal(k2, (B, H), dtype=jnp.float32)

    # Deterministic params mirroring _init_weights(): weight ~ N(0, 0.02), bias = 0.
    weight = 0.02 * jax.random.normal(k3, (L, H), dtype=jnp.float32)
    bias = jnp.zeros((L,), dtype=jnp.float32)
    weight_t, bias2 = prepare_regressor_params(weight, bias)

    ref = pooled_output @ weight.T + bias

    # --- f32 path: exact nn.Linear numerics ---------------------------------
    out, loss = sequence_regression_head(sequence_output, pooled_output,
                                         weight_t, bias2, labels=None)
    jax.block_until_ready(out)
    assert out.shape == (B, L)
    assert jnp.allclose(out, ref, atol=1e-5, rtol=1e-5)
    assert loss is None

    # --- bf16-streamed path (perf mode), f32 accumulate ----------------------
    out_bf, _ = sequence_regression_head(sequence_output, pooled_output,
                                         weight_t, bias2,
                                         stream_dtype=jnp.bfloat16)
    jax.block_until_ready(out_bf)
    assert out_bf.dtype == jnp.float32
    assert jnp.allclose(out_bf, ref, atol=2e-2, rtol=2e-2)

    # --- tiled path (grid > 1; 128-aligned tiles, >=2 grid steps) -----------
    Bt = 384
    pooled_big = jax.random.normal(k4, (Bt, H), dtype=jnp.float32)
    ref_big = pooled_big @ weight.T + bias
    out_big, _ = sequence_regression_head(None, pooled_big, weight_t, bias2)
    jax.block_until_ready(out_big)
    assert jnp.allclose(out_big, ref_big, atol=1e-5, rtol=1e-5)

    out_big_bf, _ = sequence_regression_head(None, pooled_big, weight_t, bias2,
                                             stream_dtype=jnp.bfloat16)
    jax.block_until_ready(out_big_bf)
    assert jnp.allclose(out_big_bf, ref_big, atol=2e-2, rtol=2e-2)

    # --- fused multi-head path: pooled_output read once for two heads -------
    w2 = 0.02 * jax.random.normal(k5, (3, H), dtype=jnp.float32)
    b2v = jnp.zeros((3,), dtype=jnp.float32)
    wf_t, bf2 = fuse_head_params([(weight, bias), (w2, b2v)])
    out_f, _ = sequence_regression_head(None, pooled_output, wf_t, bf2)
    jax.block_until_ready(out_f)
    assert jnp.allclose(out_f[:, :L], ref, atol=1e-5, rtol=1e-5)
    assert jnp.allclose(out_f[:, L:], pooled_output @ w2.T + b2v,
                        atol=1e-5, rtol=1e-5)

    # --- loss branch ----------------------------------------------------------
    labels = jnp.array([1.0, 0.0], dtype=jnp.float32)
    _, loss_l = sequence_regression_head(sequence_output, pooled_output,
                                         weight_t, bias2, labels=labels)
    jax.block_until_ready(loss_l)
    ref_loss = jnp.mean(
        (ref - labels.astype(jnp.int32).astype(jnp.float32)[:, None]) ** 2)
    assert jnp.allclose(loss_l, ref_loss, atol=1e-5, rtol=1e-5)

    print("KERNEL_OK")
</pallas_src>

<mosaic_0001>
module attributes {stable_mosaic.version = 11 : i64} {
  func.func @_regression_head_kernel(%arg0: i32, %arg1: memref<2x32xf32, #tpu.memory_space<vmem>>, %arg2: memref<32x4xf32, #tpu.memory_space<vmem>>, %arg3: memref<1x4xf32, #tpu.memory_space<vmem>>, %arg4: memref<2x4xf32, #tpu.memory_space<vmem>>) attributes {dimension_semantics = [#tpu.dimension_semantics<parallel>], iteration_bounds = array<i64: 1>, scalar_prefetch = 0 : i64, scratch_operands = 0 : i64, tpu.core_type = #tpu.core_type<tc>, window_params = [{transform_indices = @transform_0, window_bounds = array<i64: 2, 32>}, {pipeline_mode = #tpu.pipeline_mode<synchronous>, transform_indices = @transform_1, window_bounds = array<i64: 32, 4>}, {pipeline_mode = #tpu.pipeline_mode<synchronous>, transform_indices = @transform_2, window_bounds = array<i64: 1, 4>}, {transform_indices = @transform_3, window_bounds = array<i64: 2, 4>}]} {
    %c0 = arith.constant 0 : index
    %c0_0 = arith.constant 0 : index
    %0 = vector.load %arg1[%c0, %c0_0] : memref<2x32xf32, #tpu.memory_space<vmem>>, vector<2x32xf32>
    %c0_1 = arith.constant 0 : index
    %c0_2 = arith.constant 0 : index
    %1 = vector.load %arg2[%c0_1, %c0_2] : memref<32x4xf32, #tpu.memory_space<vmem>>, vector<32x4xf32>
    %cst = arith.constant dense<0.000000e+00> : vector<2x4xf32>
    %2 = tpu.matmul %0, %1, %cst {dimension_numbers = #tpu.dot_dimension_numbers<[1], [0], [0], [1], [0, 0, 1, 1], [], []>} : vector<2x32xf32>, vector<32x4xf32>, vector<2x4xf32> -> vector<2x4xf32>
    %c0_3 = arith.constant 0 : index
    %c0_4 = arith.constant 0 : index
    %3 = vector.load %arg3[%c0_3, %c0_4] : memref<1x4xf32, #tpu.memory_space<vmem>>, vector<1x4xf32>
    %4 = vector.broadcast %3 : vector<1x4xf32> to vector<2x4xf32>
    %5 = arith.addf %2, %4 : vector<2x4xf32>
    %c0_5 = arith.constant 0 : index
    %c0_6 = arith.constant 0 : index
    %6 = vector.load %arg4[%c0_5, %c0_6] : memref<2x4xf32, #tpu.memory_space<vmem>>, vector<2x4xf32>
    tpu.vector_store %arg4[%c0_5, %c0_6], %5 {strides = array<i32>} : memref<2x4xf32, #tpu.memory_space<vmem>>, vector<2x4xf32>,
    return
  }
  func.func @transform_0(%arg0: i32) -> (i32, i32) {
    %c0_i32 = arith.constant 0 : i32
    %c0_i32_0 = arith.constant 0 : i32
    return %arg0, %c0_i32 : i32, i32
  }
  func.func @transform_1(%arg0: i32) -> (i32, i32) {
    %c0_i32 = arith.constant 0 : i32
    %c0_i32_0 = arith.constant 0 : i32
    %c0_i32_1 = arith.constant 0 : i32
    return %c0_i32, %c0_i32_0 : i32, i32
  }
  func.func @transform_2(%arg0: i32) -> (i32, i32) {
    %c0_i32 = arith.constant 0 : i32
    %c0_i32_0 = arith.constant 0 : i32
    %c0_i32_1 = arith.constant 0 : i32
    return %c0_i32, %c0_i32_0 : i32, i32
  }
  func.func @transform_3(%arg0: i32) -> (i32, i32) {
    %c0_i32 = arith.constant 0 : i32
    %c0_i32_0 = arith.constant 0 : i32
    return %arg0, %c0_i32 : i32, i32
  }
}

</mosaic_0001>

<bundles_post_ra>
// kernel: tpu_custom_call.1
= control target key start
LH: loop header
LB: loop body
LE: loop exit
PB: predicated region body
PF: predicated region fallthrough
CT: control target
= control target key end

     0   :  { %v169_v3 = vmov 0.0|0.0   ;;  %vm170_vm0 = vmmov 0   ;;  %v171_v6 = vmov 0.0   ;;  %s223_s0 = inlined_call_operand.vmem [shape: f32[2,32], index: 0, kind: input, shape index: {}]   ;;  %s224_s1 = inlined_call_operand.vmem [shape: f32[32,4], index: 1, kind: input, shape index: {}]   ;;  %s225_s2 = inlined_call_operand.vmem [shape: f32[1,4], index: 2, kind: input, shape index: {}]   ;;  %s226_s3 = inlined_call_operand.hbm [shape: f32[2,4], index: 3, kind: output, shape index: {}]  }
   0x1   :  { %v16_v0 = vld [vmem:[%s224_s1] sm:$0xff]  ;;  %v17_v1 = vld [vmem:[%s224_s1 + $0x8] sm:$0xff]  ;;  %v18_v2 = vld [vmem:[%s224_s1 + $0x10] sm:$0xff]  ;;  %135 = vmatprep.subr.bf16.mxu0 %v169_v3  ;;  %132 = vmatprep.mubr.msk.f32.mxu0 %vm170_vm0, %v171_v6 }
   0x2   :  { %v136_v4 = vpack.c.bf16 %v17_v1, %v16_v0  ;;  %v19_v5 = vld [vmem:[%s224_s1 + $0x18] sm:$0xff] }
   0x3   :  { %8 = vsyncpa [#allocation3], 0  ;;  %v139_v7 = vpack.c.bf16 %v19_v5, %v18_v2  ;;  %v15_v8 = vld [vmem:[%s223_s0] sm:$0x3]  ;;  %vm27_vm1 = vcmask 261120   ;;  %s172_s24 = smov [#allocation2]  }
   0x4   :  { %137 = vmatpush3.bf16.msra.mxu0 %v136_v4  ;;  %v117_v9 = vld [vmem:[%s225_s2] ss:$0 sm:$0xff]  ;;  %s109_s1 = sshll.u32 %s172_s24, 4  ;;  %vm101_vm2 = vcmask 25600   ;;  %s110_s1 = int_to_ptr.vmem [resolvable:$true] %s109_s1 }
   0x5   :  { %138 = vmatprep.subr.bf16.mxu0 %v169_v3  ;;  %s145_s25 = scalar_lea.vmem %s110_s1, 32  ;;  %p150_p1 = scmp.lt.s32.totalorder %s110_s1, %s110_s1 }
   0x6   :  { %p146_p0 = scmp.ne.s32.totalorder %s110_s1, %s145_s25  ;;  %p151_p2 = scmp.lt.s32.totalorder %s145_s25, %s145_s25 }
   0x8   :  { %140 = vmatpush3.bf16.msra.mxu0 %v139_v7  ;;  %p152_p3 = por %p151_p2, %p150_p1 }
   0xa   :  { %p153_p4 = pnand %p152_p3, %p146_p0 }
   0xb   :  { %133 = vmatmul.mubr.msk.f32.vlgmr.msra.gmra.mrb[0].mxu0 %vm27_vm1, %v15_v8 }
  0xde   :  { %v97_v10 = vpop.f32.mrb[0].mxu0 }
  0xdf   :  { %v98_v11 = vadd.f32 %v117_v9, %v97_v10  ;;  %v134_v12 = vpop.f32.mrb[1].mxu0 }
  0xe1   :  { %102 = vst.msk [vmem:[#allocation2] sm:$0x3] %vm101_vm2, %v98_v11 }
  0xe2   :  { %156 = shalt.err (!%p153_p4)
}
  0xe3   :  { %s157_s27 = scalar_lea.hbm %s226_s3, 32 }
  0xe4   :  { %p158_p5 = scmp.ne.s32.totalorder %s226_s3, %s157_s27  ;;  %p161_p6 = scmp.lt.u32.totalorder %s157_s27, %s226_s3 }
  0xe6   :  { %p163_p7 = pnand %p161_p6, %p158_p5 }
  0xe8   :  { %166 = shalt.err (!%p163_p7)
}
  0xe9   :  { %112 = dma.vmem_to_hbm [thread:$0]  %s110_s1, 32, %s226_s3, [#allocation3]  }
  0xea   :  { %167 = dma.done.wait [#allocation3], 32  }
  0xeb   :  { %168 = vsyncadd [#allocation3], 4294967264 }
  0xec   :  { %116 = vsyncpa [#allocation3], 1 }

</bundles_post_ra>
